<compile_context>
chip_gen: v6e
topology: v6e:2x2x1
jax: 0.10.0
libtpu: 0.0.40
codegen_flags: <defaults>
</compile_context>

<pallas_src>
import jax
import jax.numpy as jnp
from jax.experimental import pallas as pl
from jax.experimental.pallas import tpu as pltpu

EPS = 1e-5

# Optional: bf16 matmul operands with f32 accumulation (closer to v6e/v7x MXU peak).
# Off by default: it would break the 1e-4 f32 tolerance of the self-test.
USE_BF16_MATMUL = False


def _bn_scale_shift(h, gamma, beta, inv_nl):
    """Training-mode BatchNorm1d folded into a per-channel FMA.

    h: (N, C, L) f32; gamma/beta: (1, C, 1) f32.
    Two-pass mean/var (numerically matches the reference better than E[x^2]-mean^2).
    Returns (scale, shift) so BN(h) == h * scale + shift.
    """
    mean = jnp.sum(h, axis=(0, 2), keepdims=True) * inv_nl        # (1, C, 1)
    d = h - mean
    var = jnp.sum(d * d, axis=(0, 2), keepdims=True) * inv_nl     # (1, C, 1)
    scale = gamma * jax.lax.rsqrt(var + EPS)
    shift = beta - mean * scale
    return scale, shift


def _conv3(x, w, not_first, not_last, l):
    """Conv1d(k=3, stride=1, padding=1, bias=False) on (N, Cin, L) activations.

    w: (3, Cout, Cin), tap-major.  Three accumulating batched MXU matmuls; the +-1
    taps are generated with pltpu.roll on the lane axis and a boundary-column mask,
    so there is no concatenate copy, no unaligned lane slice, no lane-merging reshape.
    """
    n = x.shape[0]
    cout = w.shape[1]
    cin = w.shape[2]

    def tap_dot(wk, xt):
        if USE_BF16_MATMUL:
            wk = wk.astype(jnp.bfloat16)
            xt = xt.astype(jnp.bfloat16)
        wb = jnp.broadcast_to(wk, (n, cout, cin))     # tiny shared-weight broadcast
        return jnp.einsum('nok,nkl->nol', wb, xt,
                          preferred_element_type=jnp.float32)

    # center tap (k=1): uses x[l]
    h = tap_dot(w[1], x)
    # left tap (k=0): uses x[l-1]; the wrapped column l == 0 is the zero padding
    x_m1 = jnp.where(not_first, pltpu.roll(x, 1, 2), 0.0)
    h = h + tap_dot(w[0], x_m1)
    # right tap (k=2): uses x[l+1]; the wrapped column l == L-1 is the zero padding
    x_p1 = jnp.where(not_last, pltpu.roll(x, l - 1, 2), 0.0)
    h = h + tap_dot(w[2], x_p1)
    return h


def residual_block_kernel(x_ref, w1_ref, w2_ref, g1_ref, b1_ref, g2_ref, b2_ref, o_ref):
    n, c, l = x_ref.shape
    inv_nl = 1.0 / float(n * l)

    lane = jax.lax.broadcasted_iota(jnp.int32, (n, c, l), 2)
    not_first = lane > 0                 # mask for the wrapped column of the +1 roll
    not_last = lane < (l - 1)            # mask for the wrapped column of the -1 roll

    x = x_ref[...]                       # (N, C, L), aligned whole-block read
    w1 = w1_ref[...]                     # (3, C, C)
    w2 = w2_ref[...]

    # ---- conv1 -> bn1 (per-channel FMA) -> relu ----
    h = _conv3(x, w1, not_first, not_last, l)
    s1, t1 = _bn_scale_shift(h, g1_ref[...], b1_ref[...], inv_nl)
    h = jnp.maximum(h * s1 + t1, 0.0)

    # ---- conv2 -> bn2 ----
    h2 = _conv3(h, w2, not_first, not_last, l)
    s2, t2 = _bn_scale_shift(h2, g2_ref[...], b2_ref[...], inv_nl)

    # ---- residual add (identity = x, stride=1, no downsample) -> relu ----
    o_ref[...] = jnp.maximum(h2 * s2 + t2 + x, 0.0).astype(o_ref.dtype)  # lane-dense store


def _vmem_budget_bytes():
    """Per-generation scoped-VMEM budget: 75% of physical capacity.

    v7x (64 MiB/TC) -> 48 MiB; v5e/v6e (128 MiB) -> 96 MiB.  Headroom is left for
    compiler-internal scratch and the input/output buffers.
    """
    cap = 64 << 20                      # conservative fallback (v7x physical per TC)
    try:
        cap = int(pltpu.get_tpu_info().vmem_capacity_bytes)
    except Exception:
        pass
    return (3 * cap) // 4


def residual_block(x, w1, g1, b1, w2, g2, b2):
    """x: (N, C, L). w*: PyTorch Conv1d layout (Cout, Cin, 3); BN params: (C,)."""
    n, c, l = x.shape

    # Activations stay in the module's (N, C, L) layout: no HBM relayout passes.
    x32 = x.astype(jnp.float32)
    # Tap-major weights (3, Cout, Cin) so each tap is a contiguous leading-dim slice.
    w1t = jnp.transpose(w1, (2, 0, 1)).astype(jnp.float32)
    w2t = jnp.transpose(w2, (2, 0, 1)).astype(jnp.float32)
    # Per-channel BN affine params shaped for direct (N, C, L) broadcast.
    g1k = g1.reshape(1, c, 1).astype(jnp.float32)
    b1k = b1.reshape(1, c, 1).astype(jnp.float32)
    g2k = g2.reshape(1, c, 1).astype(jnp.float32)
    b2k = b2.reshape(1, c, 1).astype(jnp.float32)

    # No grid -> single invocation: whole-array VMEM blocks, single-buffered.
    vmem = pl.BlockSpec(memory_space=pltpu.MemorySpace.VMEM)

    act_bytes = n * c * l * 4
    # ~8 live (N, C, L)-sized f32 values (x, rolled/masked taps, h, h2, BN diffs) + IO.
    need = 10 * act_bytes + 2 * 3 * c * c * 4 + (2 << 20)
    vmem_limit = int(min(max(need, 8 << 20), _vmem_budget_bytes()))

    # Advisory cost estimate: 2 convs x 3 taps of 2*Cout*Cin*N*L flops each.
    flops = 2 * 3 * (2 * c * c * n * l)
    bytes_accessed = 4 * (2 * n * c * l + 2 * 3 * c * c + 4 * c)

    return pl.pallas_call(
        residual_block_kernel,
        out_shape=jax.ShapeDtypeStruct((n, c, l), jnp.float32),
        in_specs=[vmem] * 7,
        out_specs=vmem,
        compiler_params=pltpu.CompilerParams(vmem_limit_bytes=vmem_limit),
        cost_estimate=pl.CostEstimate(flops=flops, transcendentals=2 * c,
                                      bytes_accessed=bytes_accessed),
    )(x32, w1t, w2t, g1k, b1k, g2k, b2k)


# ----------------------------- pure-JAX reference -----------------------------
def _ref_conv1d(x, w):
    return jax.lax.conv_general_dilated(
        x, w, window_strides=(1,), padding=[(1, 1)],
        dimension_numbers=("NCH", "OIH", "NCH"),
    )


def _ref_bn(x, gamma, beta):
    mean = jnp.mean(x, axis=(0, 2), keepdims=True)
    var = jnp.mean((x - mean) ** 2, axis=(0, 2), keepdims=True)
    return (x - mean) / jnp.sqrt(var + EPS) * gamma.reshape(1, -1, 1) + beta.reshape(1, -1, 1)


def residual_block_ref(x, w1, g1, b1, w2, g2, b2):
    h = jnp.maximum(_ref_bn(_ref_conv1d(x, w1), g1, b1), 0.0)
    h = _ref_bn(_ref_conv1d(h, w2), g2, b2)
    return jnp.maximum(h + x, 0.0)


if __name__ == "__main__":
    # Small shapes consistent with the module: inplanes == planes, stride=1, no downsample.
    N, C, L = 2, 8, 128
    key = jax.random.PRNGKey(0)
    kx, kw1, kw2, kg1, kb1, kg2, kb2 = jax.random.split(key, 7)

    x = jax.random.normal(kx, (N, C, L), dtype=jnp.float32)
    w1 = 0.1 * jax.random.normal(kw1, (C, C, 3), dtype=jnp.float32)   # conv1.weight
    w2 = 0.1 * jax.random.normal(kw2, (C, C, 3), dtype=jnp.float32)   # conv2.weight
    g1 = 1.0 + 0.1 * jax.random.normal(kg1, (C,), dtype=jnp.float32)  # bn1.weight
    b1 = 0.1 * jax.random.normal(kb1, (C,), dtype=jnp.float32)        # bn1.bias
    g2 = 1.0 + 0.1 * jax.random.normal(kg2, (C,), dtype=jnp.float32)  # bn2.weight
    b2 = 0.1 * jax.random.normal(kb2, (C,), dtype=jnp.float32)        # bn2.bias

    out = residual_block(x, w1, g1, b1, w2, g2, b2)
    out = jax.block_until_ready(out)

    ref = residual_block_ref(x, w1, g1, b1, w2, g2, b2)
    assert out.shape == (N, C, L)
    assert jnp.allclose(out, ref, atol=1e-4, rtol=1e-4), "mismatch vs reference"

    print("KERNEL_OK")
</pallas_src>

<mosaic_0001>
module attributes {stable_mosaic.version = 11 : i64} {
  func.func @residual_block_kernel(%arg0: memref<2x8x128xf32, #tpu.memory_space<vmem>>, %arg1: memref<3x8x8xf32, #tpu.memory_space<vmem>>, %arg2: memref<3x8x8xf32, #tpu.memory_space<vmem>>, %arg3: memref<1x8x1xf32, #tpu.memory_space<vmem>>, %arg4: memref<1x8x1xf32, #tpu.memory_space<vmem>>, %arg5: memref<1x8x1xf32, #tpu.memory_space<vmem>>, %arg6: memref<1x8x1xf32, #tpu.memory_space<vmem>>, %arg7: memref<2x8x128xf32, #tpu.memory_space<vmem>>) attributes {dimension_semantics = [], scalar_prefetch = 0 : i64, scratch_operands = 0 : i64, tpu.core_type = #tpu.core_type<tc>} {
    %0 = tpu.iota {dimensions = array<i32: 2>} : vector<2x8x128xi32>
    %c0_i32 = arith.constant 0 : i32
    %1 = vector.broadcast %c0_i32 : i32 to vector<2x8x128xi32>
    %2 = arith.cmpi sgt, %0, %1 : vector<2x8x128xi32>
    %c127_i32 = arith.constant 127 : i32
    %3 = vector.broadcast %c127_i32 : i32 to vector<2x8x128xi32>
    %4 = arith.cmpi slt, %0, %3 : vector<2x8x128xi32>
    %c0 = arith.constant 0 : index
    %c0_0 = arith.constant 0 : index
    %c0_1 = arith.constant 0 : index
    %5 = vector.load %arg0[%c0, %c0_0, %c0_1] : memref<2x8x128xf32, #tpu.memory_space<vmem>>, vector<2x8x128xf32>
    %c0_2 = arith.constant 0 : index
    %c0_3 = arith.constant 0 : index
    %c0_4 = arith.constant 0 : index
    %6 = vector.load %arg1[%c0_2, %c0_3, %c0_4] : memref<3x8x8xf32, #tpu.memory_space<vmem>>, vector<3x8x8xf32>
    %c0_5 = arith.constant 0 : index
    %c0_6 = arith.constant 0 : index
    %c0_7 = arith.constant 0 : index
    %7 = vector.load %arg2[%c0_5, %c0_6, %c0_7] : memref<3x8x8xf32, #tpu.memory_space<vmem>>, vector<3x8x8xf32>
    %8 = vector.extract_strided_slice %6 {offsets = [1, 0, 0], sizes = [1, 8, 8], strides = [1, 1, 1]} : vector<3x8x8xf32> to vector<1x8x8xf32>
    %9 = vector.shape_cast %8 : vector<1x8x8xf32> to vector<8x8xf32>
    %10 = vector.shape_cast %9 : vector<8x8xf32> to vector<1x8x8xf32>
    %11 = vector.broadcast %10 : vector<1x8x8xf32> to vector<2x8x8xf32>
    "tpu.trace_start"() <{level = 10 : i32, message = "nok,nkl->nol"}> : () -> ()
    %cst = arith.constant dense<0.000000e+00> : vector<2x8x128xf32>
    %12 = tpu.matmul %11, %5, %cst {dimension_numbers = #tpu.dot_dimension_numbers<[2], [1], [1], [2], [0, 0, 0, 1, 1, 2], [0], [0]>} : vector<2x8x8xf32>, vector<2x8x128xf32>, vector<2x8x128xf32> -> vector<2x8x128xf32>
    %c1_i32 = arith.constant 1 : i32
    "tpu.trace_stop"() : () -> ()
    %13 = tpu.dynamic_rotate %5 by %c1_i32 dim 2 : vector<2x8x128xf32>, i32 -> vector<2x8x128xf32>
    %cst_8 = arith.constant 0.000000e+00 : f32
    %14 = vector.broadcast %cst_8 : f32 to vector<2x8x128xf32>
    %15 = arith.select %2, %13, %14 : vector<2x8x128xi1>, vector<2x8x128xf32>
    %16 = vector.extract_strided_slice %6 {offsets = [0, 0, 0], sizes = [1, 8, 8], strides = [1, 1, 1]} : vector<3x8x8xf32> to vector<1x8x8xf32>
    %17 = vector.shape_cast %16 : vector<1x8x8xf32> to vector<8x8xf32>
    %18 = vector.shape_cast %17 : vector<8x8xf32> to vector<1x8x8xf32>
    %19 = vector.broadcast %18 : vector<1x8x8xf32> to vector<2x8x8xf32>
    "tpu.trace_start"() <{level = 10 : i32, message = "nok,nkl->nol"}> : () -> ()
    %cst_9 = arith.constant dense<0.000000e+00> : vector<2x8x128xf32>
    %20 = tpu.matmul %19, %15, %cst_9 {dimension_numbers = #tpu.dot_dimension_numbers<[2], [1], [1], [2], [0, 0, 0, 1, 1, 2], [0], [0]>} : vector<2x8x8xf32>, vector<2x8x128xf32>, vector<2x8x128xf32> -> vector<2x8x128xf32>
    "tpu.trace_stop"() : () -> ()
    %21 = arith.addf %12, %20 : vector<2x8x128xf32>
    %c127_i32_10 = arith.constant 127 : i32
    %22 = tpu.dynamic_rotate %5 by %c127_i32_10 dim 2 : vector<2x8x128xf32>, i32 -> vector<2x8x128xf32>
    %cst_11 = arith.constant 0.000000e+00 : f32
    %23 = vector.broadcast %cst_11 : f32 to vector<2x8x128xf32>
    %24 = arith.select %4, %22, %23 : vector<2x8x128xi1>, vector<2x8x128xf32>
    %25 = vector.extract_strided_slice %6 {offsets = [2, 0, 0], sizes = [1, 8, 8], strides = [1, 1, 1]} : vector<3x8x8xf32> to vector<1x8x8xf32>
    %26 = vector.shape_cast %25 : vector<1x8x8xf32> to vector<8x8xf32>
    %27 = vector.shape_cast %26 : vector<8x8xf32> to vector<1x8x8xf32>
    %28 = vector.broadcast %27 : vector<1x8x8xf32> to vector<2x8x8xf32>
    "tpu.trace_start"() <{level = 10 : i32, message = "nok,nkl->nol"}> : () -> ()
    %cst_12 = arith.constant dense<0.000000e+00> : vector<2x8x128xf32>
    %29 = tpu.matmul %28, %24, %cst_12 {dimension_numbers = #tpu.dot_dimension_numbers<[2], [1], [1], [2], [0, 0, 0, 1, 1, 2], [0], [0]>} : vector<2x8x8xf32>, vector<2x8x128xf32>, vector<2x8x128xf32> -> vector<2x8x128xf32>
    "tpu.trace_stop"() : () -> ()
    %30 = arith.addf %21, %29 : vector<2x8x128xf32>
    %c0_13 = arith.constant 0 : index
    %c0_14 = arith.constant 0 : index
    %c0_15 = arith.constant 0 : index
    %31 = vector.load %arg3[%c0_13, %c0_14, %c0_15] : memref<1x8x1xf32, #tpu.memory_space<vmem>>, vector<1x8x1xf32>
    %c0_16 = arith.constant 0 : index
    %c0_17 = arith.constant 0 : index
    %c0_18 = arith.constant 0 : index
    %32 = vector.load %arg4[%c0_16, %c0_17, %c0_18] : memref<1x8x1xf32, #tpu.memory_space<vmem>>, vector<1x8x1xf32>
    %cst_19 = arith.constant dense<0.000000e+00> : vector<8xf32>
    %33 = vector.multi_reduction <add>, %30, %cst_19 [0, 2] : vector<2x8x128xf32> to vector<8xf32>
    %34 = vector.shape_cast %33 : vector<8xf32> to vector<1x8x1xf32>
    %cst_20 = arith.constant 3.906250e-03 : f32
    %35 = vector.broadcast %cst_20 : f32 to vector<1x8x1xf32>
    %36 = arith.mulf %34, %35 : vector<1x8x1xf32>
    %37 = vector.broadcast %36 : vector<1x8x1xf32> to vector<2x8x128xf32>
    %38 = arith.subf %30, %37 : vector<2x8x128xf32>
    %39 = arith.mulf %38, %38 : vector<2x8x128xf32>
    %cst_21 = arith.constant dense<0.000000e+00> : vector<8xf32>
    %40 = vector.multi_reduction <add>, %39, %cst_21 [0, 2] : vector<2x8x128xf32> to vector<8xf32>
    %41 = vector.shape_cast %40 : vector<8xf32> to vector<1x8x1xf32>
    %cst_22 = arith.constant 3.906250e-03 : f32
    %42 = vector.broadcast %cst_22 : f32 to vector<1x8x1xf32>
    %43 = arith.mulf %41, %42 : vector<1x8x1xf32>
    %cst_23 = arith.constant 9.99999974E-6 : f32
    %44 = vector.broadcast %cst_23 : f32 to vector<1x8x1xf32>
    %45 = arith.addf %43, %44 : vector<1x8x1xf32>
    %46 = math.rsqrt %45 : vector<1x8x1xf32>
    %47 = arith.mulf %31, %46 : vector<1x8x1xf32>
    %48 = arith.mulf %36, %47 : vector<1x8x1xf32>
    %49 = arith.subf %32, %48 : vector<1x8x1xf32>
    %50 = vector.broadcast %47 : vector<1x8x1xf32> to vector<2x8x128xf32>
    %51 = arith.mulf %30, %50 : vector<2x8x128xf32>
    %52 = vector.broadcast %49 : vector<1x8x1xf32> to vector<2x8x128xf32>
    %53 = arith.addf %51, %52 : vector<2x8x128xf32>
    %cst_24 = arith.constant 0.000000e+00 : f32
    %54 = vector.broadcast %cst_24 : f32 to vector<2x8x128xf32>
    %55 = arith.maximumf %53, %54 : vector<2x8x128xf32>
    %56 = vector.extract_strided_slice %7 {offsets = [1, 0, 0], sizes = [1, 8, 8], strides = [1, 1, 1]} : vector<3x8x8xf32> to vector<1x8x8xf32>
    %57 = vector.shape_cast %56 : vector<1x8x8xf32> to vector<8x8xf32>
    %58 = vector.shape_cast %57 : vector<8x8xf32> to vector<1x8x8xf32>
    %59 = vector.broadcast %58 : vector<1x8x8xf32> to vector<2x8x8xf32>
    "tpu.trace_start"() <{level = 10 : i32, message = "nok,nkl->nol"}> : () -> ()
    %cst_25 = arith.constant dense<0.000000e+00> : vector<2x8x128xf32>
    %60 = tpu.matmul %59, %55, %cst_25 {dimension_numbers = #tpu.dot_dimension_numbers<[2], [1], [1], [2], [0, 0, 0, 1, 1, 2], [0], [0]>} : vector<2x8x8xf32>, vector<2x8x128xf32>, vector<2x8x128xf32> -> vector<2x8x128xf32>
    %c1_i32_26 = arith.constant 1 : i32
    "tpu.trace_stop"() : () -> ()
    %61 = tpu.dynamic_rotate %55 by %c1_i32_26 dim 2 : vector<2x8x128xf32>, i32 -> vector<2x8x128xf32>
    %cst_27 = arith.constant 0.000000e+00 : f32
    %62 = vector.broadcast %cst_27 : f32 to vector<2x8x128xf32>
    %63 = arith.select %2, %61, %62 : vector<2x8x128xi1>, vector<2x8x128xf32>
    %64 = vector.extract_strided_slice %7 {offsets = [0, 0, 0], sizes = [1, 8, 8], strides = [1, 1, 1]} : vector<3x8x8xf32> to vector<1x8x8xf32>
    %65 = vector.shape_cast %64 : vector<1x8x8xf32> to vector<8x8xf32>
    %66 = vector.shape_cast %65 : vector<8x8xf32> to vector<1x8x8xf32>
    %67 = vector.broadcast %66 : vector<1x8x8xf32> to vector<2x8x8xf32>
    "tpu.trace_start"() <{level = 10 : i32, message = "nok,nkl->nol"}> : () -> ()
    %cst_28 = arith.constant dense<0.000000e+00> : vector<2x8x128xf32>
    %68 = tpu.matmul %67, %63, %cst_28 {dimension_numbers = #tpu.dot_dimension_numbers<[2], [1], [1], [2], [0, 0, 0, 1, 1, 2], [0], [0]>} : vector<2x8x8xf32>, vector<2x8x128xf32>, vector<2x8x128xf32> -> vector<2x8x128xf32>
    "tpu.trace_stop"() : () -> ()
    %69 = arith.addf %60, %68 : vector<2x8x128xf32>
    %c127_i32_29 = arith.constant 127 : i32
    %70 = tpu.dynamic_rotate %55 by %c127_i32_29 dim 2 : vector<2x8x128xf32>, i32 -> vector<2x8x128xf32>
    %cst_30 = arith.constant 0.000000e+00 : f32
    %71 = vector.broadcast %cst_30 : f32 to vector<2x8x128xf32>
    %72 = arith.select %4, %70, %71 : vector<2x8x128xi1>, vector<2x8x128xf32>
    %73 = vector.extract_strided_slice %7 {offsets = [2, 0, 0], sizes = [1, 8, 8], strides = [1, 1, 1]} : vector<3x8x8xf32> to vector<1x8x8xf32>
    %74 = vector.shape_cast %73 : vector<1x8x8xf32> to vector<8x8xf32>
    %75 = vector.shape_cast %74 : vector<8x8xf32> to vector<1x8x8xf32>
    %76 = vector.broadcast %75 : vector<1x8x8xf32> to vector<2x8x8xf32>
    "tpu.trace_start"() <{level = 10 : i32, message = "nok,nkl->nol"}> : () -> ()
    %cst_31 = arith.constant dense<0.000000e+00> : vector<2x8x128xf32>
    %77 = tpu.matmul %76, %72, %cst_31 {dimension_numbers = #tpu.dot_dimension_numbers<[2], [1], [1], [2], [0, 0, 0, 1, 1, 2], [0], [0]>} : vector<2x8x8xf32>, vector<2x8x128xf32>, vector<2x8x128xf32> -> vector<2x8x128xf32>
    "tpu.trace_stop"() : () -> ()
    %78 = arith.addf %69, %77 : vector<2x8x128xf32>
    %c0_32 = arith.constant 0 : index
    %c0_33 = arith.constant 0 : index
    %c0_34 = arith.constant 0 : index
    %79 = vector.load %arg5[%c0_32, %c0_33, %c0_34] : memref<1x8x1xf32, #tpu.memory_space<vmem>>, vector<1x8x1xf32>
    %c0_35 = arith.constant 0 : index
    %c0_36 = arith.constant 0 : index
    %c0_37 = arith.constant 0 : index
    %80 = vector.load %arg6[%c0_35, %c0_36, %c0_37] : memref<1x8x1xf32, #tpu.memory_space<vmem>>, vector<1x8x1xf32>
    %cst_38 = arith.constant dense<0.000000e+00> : vector<8xf32>
    %81 = vector.multi_reduction <add>, %78, %cst_38 [0, 2] : vector<2x8x128xf32> to vector<8xf32>
    %82 = vector.shape_cast %81 : vector<8xf32> to vector<1x8x1xf32>
    %cst_39 = arith.constant 3.906250e-03 : f32
    %83 = vector.broadcast %cst_39 : f32 to vector<1x8x1xf32>
    %84 = arith.mulf %82, %83 : vector<1x8x1xf32>
    %85 = vector.broadcast %84 : vector<1x8x1xf32> to vector<2x8x128xf32>
    %86 = arith.subf %78, %85 : vector<2x8x128xf32>
    %87 = arith.mulf %86, %86 : vector<2x8x128xf32>
    %cst_40 = arith.constant dense<0.000000e+00> : vector<8xf32>
    %88 = vector.multi_reduction <add>, %87, %cst_40 [0, 2] : vector<2x8x128xf32> to vector<8xf32>
    %89 = vector.shape_cast %88 : vector<8xf32> to vector<1x8x1xf32>
    %cst_41 = arith.constant 3.906250e-03 : f32
    %90 = vector.broadcast %cst_41 : f32 to vector<1x8x1xf32>
    %91 = arith.mulf %89, %90 : vector<1x8x1xf32>
    %cst_42 = arith.constant 9.99999974E-6 : f32
    %92 = vector.broadcast %cst_42 : f32 to vector<1x8x1xf32>
    %93 = arith.addf %91, %92 : vector<1x8x1xf32>
    %94 = math.rsqrt %93 : vector<1x8x1xf32>
    %95 = arith.mulf %79, %94 : vector<1x8x1xf32>
    %96 = arith.mulf %84, %95 : vector<1x8x1xf32>
    %97 = arith.subf %80, %96 : vector<1x8x1xf32>
    %98 = vector.broadcast %95 : vector<1x8x1xf32> to vector<2x8x128xf32>
    %99 = arith.mulf %78, %98 : vector<2x8x128xf32>
    %100 = vector.broadcast %97 : vector<1x8x1xf32> to vector<2x8x128xf32>
    %101 = arith.addf %99, %100 : vector<2x8x128xf32>
    %102 = arith.addf %101, %5 : vector<2x8x128xf32>
    %cst_43 = arith.constant 0.000000e+00 : f32
    %103 = vector.broadcast %cst_43 : f32 to vector<2x8x128xf32>
    %104 = arith.maximumf %102, %103 : vector<2x8x128xf32>
    %c0_44 = arith.constant 0 : index
    %c0_45 = arith.constant 0 : index
    %c0_46 = arith.constant 0 : index
    %105 = vector.load %arg7[%c0_44, %c0_45, %c0_46] : memref<2x8x128xf32, #tpu.memory_space<vmem>>, vector<2x8x128xf32>
    tpu.vector_store %arg7[%c0_44, %c0_45, %c0_46], %104 {strides = array<i32>} : memref<2x8x128xf32, #tpu.memory_space<vmem>>, vector<2x8x128xf32>,
    return
  }
}

</mosaic_0001>

<bundles_post_ra>
// kernel: tpu_custom_call.1
= control target key start
LH: loop header
LB: loop body
LE: loop exit
PB: predicated region body
PF: predicated region fallthrough
CT: control target
= control target key end

     0   :  { %12 = vsyncpa [#allocation3], 0  ;;  %s1409_s0 = inlined_call_operand.hbm [shape: f32[2,8,128], index: 0, kind: input, shape index: {}]   ;;  %s1410_s1 = inlined_call_operand.vmem [shape: f32[3,8,8], index: 1, kind: input, shape index: {}]   ;;  %s1411_s2 = inlined_call_operand.hbm [shape: f32[3,8,8], index: 2, kind: input, shape index: {}]   ;;  %s1412_s3 = inlined_call_operand.vmem [shape: f32[1,8,1], index: 3, kind: input, shape index: {}]   ;;  %s1413_s4 = inlined_call_operand.vmem [shape: f32[1,8,1], index: 4, kind: input, shape index: {}]   ;;  %s1414_s5 = inlined_call_operand.vmem [shape: f32[1,8,1], index: 5, kind: input, shape index: {}]   ;;  %s1415_s6 = inlined_call_operand.vmem [shape: f32[1,8,1], index: 6, kind: input, shape index: {}]   ;;  %s1416_s7 = inlined_call_operand.hbm [shape: f32[2,8,128], index: 7, kind: output, shape index: {}]  }
   0x1   :  { %13 = vsyncpa [#allocation6], 0 }
   0x2   :  { %14 = vsyncpa [#allocation4], 0  ;;  %s1232_s24 = smov [#allocation2]  }
   0x3   :  { %s20_s25 = sshll.u32 %s1232_s24, 4  ;;  %s21_s25 = int_to_ptr.vmem [resolvable:$true] %s20_s25 }
   0x4   :  { %s1174_s26 = scalar_lea.vmem %s21_s25, 256  ;;  %p1179_p1 = scmp.lt.s32.totalorder %s21_s25, %s21_s25 }
   0x5   :  { %p1175_p0 = scmp.ne.s32.totalorder %s21_s25, %s1174_s26  ;;  %p1180_p2 = scmp.lt.s32.totalorder %s1174_s26, %s1174_s26 }
   0x7   :  { %p1181_p3 = por %p1180_p2, %p1179_p1 }
   0x9   :  { %p1182_p4 = pnand %p1181_p3, %p1175_p0 }
   0xb   :  { %1185 = shalt.err (!%p1182_p4)
}
   0xc   :  { %s1233_s27 = smov 128   ;;  %s1234_s28 = smov 8  }
   0xd   :  { %26 = dma.hbm_to_vmem [thread:$0]  %s1409_s0, 256, %s21_s25, [#allocation3], %s1233_s27, %s1233_s27, %s1234_s28  }
   0xe   :  { %s1235_s8 = smov [#allocation5]  }
   0xf   :  { %s34_s9 = sshll.u32 %s1235_s8, 4  ;;  %s35_s9 = int_to_ptr.vmem [resolvable:$true] %s34_s9 }
  0x10   :  { %s1194_s10 = scalar_lea.vmem %s35_s9, 384  ;;  %p1199_p6 = scmp.lt.s32.totalorder %s35_s9, %s35_s9 }
  0x11   :  { %p1195_p5 = scmp.ne.s32.totalorder %s35_s9, %s1194_s10  ;;  %p1200_p7 = scmp.lt.s32.totalorder %s1194_s10, %s1194_s10 }
  0x13   :  { %p1201_p8 = por %p1200_p7, %p1199_p6 }
  0x15   :  { %p1202_p9 = pnand %p1201_p8, %p1195_p5 }
  0x17   :  { %1205 = shalt.err (!%p1202_p9)
}
  0x18   :  { %40 = dma.hbm_to_vmem [thread:$0]  %s1411_s2, 384, %s35_s9, [#allocation6], %s1233_s27, %s1233_s27, %s1234_s28  }
  0x19   :  { %1226 = dma.done.wait [#allocation3], 256  }
  0x1a   :  { %1227 = vsyncadd [#allocation3], 4294967040 }
  0x1b   :  { %1228 = dma.done.wait [#allocation6], 384  }
  0x1c   :  { %1229 = vsyncadd [#allocation6], 4294966912  ;;  %v1236_v0 = vmov 0.0   ;;  %vm1237_vm0 = vmmov 0   ;;  %v1300_v1 = vld [vmem:[#allocation2] sm:$0xff]  ;;  %s1238_s0 = smov 1   ;;  %v55_v3 = vlaneseq }
  0x1d   :  { %1090 = vmatprep.subr.mxu0 %v1236_v0  ;;  %1092 = vmatprep.mubr.msk.f32.mxu0 %vm1237_vm0, %v1236_v0  ;;  %s1239_s2 = smov 127   ;;  %v1306_v2 = vld [vmem:[#allocation2 + $0x8] sm:$0xff]  ;;  %v61_v5 = vld [vmem:[%s1410_s1] sm:$0xff]  ;;  %vm73_vm2 = vcmask 64512   ;;  %v63_v10 = vld [vmem:[%s1410_s1 + $0x10] sm:$0xff]  ;;  %v1240_v36 = vmov 0  }
  0x1e   :  { %1095 = vmatprep.subr.mxu1 %v1236_v0  ;;  %1097 = vmatprep.mubr.msk.f32.mxu1 %vm1237_vm0, %v1236_v0  ;;  %v1312_v4 = vand.u32 127, %v55_v3  ;;  %v62_v8 = vld [vmem:[%s1410_s1 + $0x8] sm:$0xff]  ;;  %v511_v40 = vld [vmem:[%s1412_s3] sm:$0xff]  ;;  %v64_v54 = vld [vmem:[#allocation5] sm:$0xff]  ;;  %s1241_s24 = smov [#allocation7]  }
  0x1f   :  { %67 = vrot.lane.b32.xlu0 %v1300_v1, %s1238_s0  ;;  %360 = vrot.lane.b32.xlu1 %v1300_v1, %s1239_s2  ;;  %v512_v43 = vld [vmem:[%s1413_s4] sm:$0xff]  ;;  %v65_v57 = vld [vmem:[#allocation5 + $0x8] sm:$0xff]  ;;  %s1033_s25 = sshll.u32 %s1241_s24, 4  ;;  %s1034_s25 = int_to_ptr.vmem [resolvable:$true] %s1033_s25 }
  0x20   :  { %vm57_vm1 = vcmp.gt.s32.totalorder %v1312_v4, 0  ;;  %vm58_vm3 = vcmp.lt.s32.totalorder %v1312_v4, 127  ;;  %1160 = vset.pattern.permute.xlu0 %v1240_v36  ;;  %1161 = vset.pattern.permute.xlu1 %v1240_v36  ;;  %v66_v59 = vld [vmem:[#allocation5 + $0x10] sm:$0xff]  ;;  %p1211_p11 = scmp.lt.s32.totalorder %s1034_s25, %s1034_s25 }
  0x23   :  { %69 = vrot.lane.b32.xlu0 %v1306_v2, %s1238_s0  ;;  %362 = vrot.lane.b32.xlu1 %v1306_v2, %s1239_s2 }
  0x91   :  { %v68_v6 = vpop.permute.xlu0 %67  ;;  %v361_v7 = vpop.permute.xlu1 %360 }
  0x92   :  { %1091 = vmatpush3.msk.msra.mxu0 %vm57_vm1, %v68_v6 }
  0x93   :  { %1093 = vmatmul.mubr.msk.f32.vlgmr.msra.gmra.mxu0 %vm73_vm2, %v61_v5  ;;  %1100 = vmatprep.subr.mxu0 %v1236_v0 }
  0x94   :  { %1101 = vmatpush3.msra.mxu0 %v1300_v1  ;;  %1102 = vmatprep.mubr.msk.f32.mxu0 %vm1237_vm0, %v1236_v0 }
  0x95   :  { %v70_v9 = vpop.permute.xlu0 %69  ;;  %1110 = vmatprep.subr.mxu0 %v1236_v0  ;;  %v363_v11 = vpop.permute.xlu1 %362 }
  0x96   :  { %1096 = vmatpush3.msk.msra.mxu1 %vm57_vm1, %v70_v9 }
  0x97   :  { %1098 = vmatmul.mubr.msk.f32.vlgmr.msra.gmra.mxu1 %vm73_vm2, %v61_v5  ;;  %1103 = vmatmul.mubr.msk.f32.vlgmr.msra.gmra.mxu0 %vm73_vm2, %v62_v8 }
  0x98   :  { %1105 = vmatprep.subr.mxu1 %v1236_v0  ;;  %1107 = vmatprep.mubr.msk.f32.mxu1 %vm1237_vm0, %v1236_v0 }
  0x99   :  { %1106 = vmatpush3.msra.mxu1 %v1306_v2  ;;  %1111 = vmatpush3.msk.msra.mxu0 %vm58_vm3, %v361_v7 }
  0x9a   :  { %1112 = vmatprep.mubr.msk.f32.mxu0 %vm1237_vm0, %v1236_v0  ;;  %1115 = vmatprep.subr.mxu1 %v1236_v0 }
  0x9b   :  { %1108 = vmatmul.mubr.msk.f32.vlgmr.msra.gmra.mxu1 %vm73_vm2, %v62_v8  ;;  %1113 = vmatmul.mubr.msk.f32.vlgmr.msra.gmra.mxu0 %vm73_vm2, %v63_v10 }
  0x9c   :  { %1116 = vmatpush3.msk.msra.mxu1 %vm58_vm3, %v363_v11  ;;  %1117 = vmatprep.mubr.msk.f32.mxu1 %vm1237_vm0, %v1236_v0 }
  0x9d   :  { %1120 = vmatprep.subr.mxu0 %v1236_v0  ;;  %1122 = vmatprep.mubr.msk.f32.mxu0 %vm1237_vm0, %v1236_v0 }
  0x9e   :  { %1125 = vmatprep.subr.mxu1 %v1236_v0 }
  0x9f   :  { %1118 = vmatmul.mubr.msk.f32.vlgmr.msra.gmra.mxu1 %vm73_vm2, %v63_v10 }
  0xa0   :  { %1127 = vmatprep.mubr.msk.f32.mxu1 %vm1237_vm0, %v1236_v0 }
 0x153   :  { %v143_v12 = vpop.f32.mrf.mxu0 }
 0x155   :  { %v1094_v13 = vpop.f32.mrf.mxu0 }
 0x157   :  { %v213_v14 = vpop.f32.mrf.mxu1  ;;  %v286_v15 = vpop.f32.mrf.mxu0 }
 0x158   :  { %v287_v22 = vadd.f32 %v286_v15, %v143_v12 }
 0x159   :  { %v1099_v16 = vpop.f32.mrf.mxu1  ;;  %v1104_v17 = vpop.f32.mrf.mxu0 }
 0x15b   :  { %v356_v18 = vpop.f32.mrf.mxu1  ;;  %v435_v19 = vpop.f32.mrf.mxu0 }
 0x15c   :  { %v357_v23 = vadd.f32 %v356_v18, %v213_v14  ;;  %v509_v25 = vadd.f32 %v435_v19, %v287_v22 }
 0x15d   :  { %v1109_v20 = vpop.f32.mrf.mxu1  ;;  %v1114_v21 = vpop.f32.mrf.mxu0 }
 0x15f   :  { %v505_v24 = vpop.f32.mrf.mxu1 }
 0x160   :  { %v510_v26 = vadd.f32 %v505_v24, %v357_v23 }
 0x161   :  { %v1119_v27 = vpop.f32.mrf.mxu1 }
 0x162   :  { %v513_v28 = vadd.f32 %v510_v26, %v509_v25 }
 0x164   :  { %514 = vadd.xlane.f32.xlu0 %v513_v28 }
 0x1ed   :  { %v515_v29 = vpop.xlane.xlu0 %514 }
 0x1ee   :  { %v516_v30 = vmul.f32 0.00390625, %v515_v29  ;;  %v990_v29 = vld [vmem:[%s1415_s6] sm:$0xff] }
 0x1f0   :  { %v517_v31 = vsub.f32 %v509_v25, %v516_v30  ;;  %v518_v32 = vsub.f32 %v510_v26, %v516_v30 }
 0x1f2   :  { %v519_v33 = vmul.f32 %v517_v31, %v517_v31  ;;  %v520_v34 = vmul.f32 %v518_v32, %v518_v32 }
 0x1f4   :  { %v521_v35 = vadd.f32 %v520_v34, %v519_v33 }
 0x1f6   :  { %522 = vadd.xlane.f32.xlu1 %v521_v35 }
 0x27f   :  { %v523_v37 = vpop.xlane.xlu1 %522 }
 0x280   :  { %v524_v38 = vmul.f32 0.00390625, %v523_v37 }
 0x282   :  { %v525_v39 = vadd.f32 1e-05, %v524_v38 }
 0x284   :  { %1162 = vrsqrt.f32 %v525_v39 }
 0x291   :  { %v1163_v41 = vpop.eup %1162 }
 0x292   :  { %v527_v42 = vmul.f32 %v1163_v41, %v511_v40 }
 0x294   :  { %532 = vperm.xlu0 %1160, %v527_v42   ;;  %v528_v44 = vmul.f32 %v527_v42, %v516_v30 }
 0x296   :  { %v529_v45 = vsub.f32 %v512_v43, %v528_v44 }
 0x298   :  { %539 = vperm.xlu1 %1161, %v529_v45  }
 0x30f   :  { %v533_v46 = vpop.permute.xlu0 %532 }
 0x310   :  { %v535_v47 = vmul.f32 %v533_v46, %v509_v25  ;;  %v536_v49 = vmul.f32 %v533_v46, %v510_v26  ;;  %v989_v26 = vld [vmem:[%s1414_s5] sm:$0xff]  ;;  %s1206_s5 = scalar_lea.vmem %s1034_s25, 256 }
 0x311   :  { %p1207_p10 = scmp.ne.s32.totalorder %s1034_s25, %s1206_s5  ;;  %p1212_p12 = scmp.lt.s32.totalorder %s1206_s5, %s1206_s5 }
 0x313   :  { %v540_v48 = vpop.permute.xlu1 %539  ;;  %p1213_p13 = por %p1212_p12, %p1211_p11 }
 0x314   :  { %v542_v50 = vadd.f32 %v540_v48, %v535_v47  ;;  %v543_v51 = vadd.f32 %v540_v48, %v536_v49 }
 0x315   :  { %p1214_p0 = pnand %p1213_p13, %p1207_p10 }
 0x316   :  { %v544_v52 = vmax.f32 %v542_v50, 0.0  ;;  %v545_v53 = vmax.f32 %v543_v51, 0.0 }
 0x318   :  { %546 = vrot.lane.b32.xlu1 %v544_v52, %s1238_s0 }
 0x31c   :  { %548 = vrot.lane.b32.xlu1 %v545_v53, %s1238_s0 }
 0x320   :  { %838 = vrot.lane.b32.xlu1 %v544_v52, %s1239_s2 }
 0x324   :  { %840 = vrot.lane.b32.xlu1 %v545_v53, %s1239_s2 }
 0x38a   :  { %v547_v55 = vpop.permute.xlu1 %546 }
 0x38b   :  { %1121 = vmatpush3.msk.msra.mxu0 %vm57_vm1, %v547_v55 }
 0x38c   :  { %1130 = vmatprep.subr.mxu0 %v1236_v0  ;;  %1123 = vmatmul.mubr.msk.f32.vlgmr.msra.gmra.mxu0 %vm73_vm2, %v64_v54 }
 0x38d   :  { %1131 = vmatpush3.msra.mxu0 %v544_v52  ;;  %1132 = vmatprep.mubr.msk.f32.mxu0 %vm1237_vm0, %v1236_v0 }
 0x38e   :  { %v549_v56 = vpop.permute.xlu1 %548  ;;  %1140 = vmatprep.subr.mxu0 %v1236_v0 }
 0x38f   :  { %1126 = vmatpush3.msk.msra.mxu1 %vm57_vm1, %v549_v56 }
 0x390   :  { %1128 = vmatmul.mubr.msk.f32.vlgmr.msra.gmra.mxu1 %vm73_vm2, %v64_v54  ;;  %1135 = vmatprep.subr.mxu1 %v1236_v0 }
 0x391   :  { %1133 = vmatmul.mubr.msk.f32.vlgmr.msra.gmra.mxu0 %vm73_vm2, %v65_v57  ;;  %1136 = vmatpush3.msra.mxu1 %v545_v53 }
 0x392   :  { %v839_v58 = vpop.permute.xlu1 %838  ;;  %1137 = vmatprep.mubr.msk.f32.mxu1 %vm1237_vm0, %v1236_v0  ;;  %1142 = vmatprep.mubr.msk.f32.mxu0 %vm1237_vm0, %v1236_v0 }
 0x393   :  { %1141 = vmatpush3.msk.msra.mxu0 %vm58_vm3, %v839_v58  ;;  %1145 = vmatprep.subr.mxu1 %v1236_v0 }
 0x394   :  { %1138 = vmatmul.mubr.msk.f32.vlgmr.msra.gmra.mxu1 %vm73_vm2, %v65_v57 }
 0x395   :  { %1143 = vmatmul.mubr.msk.f32.vlgmr.msra.gmra.mxu0 %vm73_vm2, %v66_v59  ;;  %1147 = vmatprep.mubr.msk.f32.mxu1 %vm1237_vm0, %v1236_v0 }
 0x396   :  { %v841_v60 = vpop.permute.xlu1 %840 }
 0x397   :  { %1146 = vmatpush3.msk.msra.mxu1 %vm58_vm3, %v841_v60 }
 0x398   :  { %1148 = vmatmul.mubr.msk.f32.vlgmr.msra.gmra.mxu1 %vm73_vm2, %v66_v59 }
 0x44c   :  { %v621_v61 = vpop.f32.mrf.mxu0 }
 0x44e   :  { %v1124_v62 = vpop.f32.mrf.mxu0 }
 0x450   :  { %v691_v63 = vpop.f32.mrf.mxu1 }
 0x451   :  { %v764_v3 = vpop.f32.mrf.mxu0 }
 0x452   :  { %v1129_v5 = vpop.f32.mrf.mxu1  ;;  %v765_v10 = vadd.f32 %v764_v3, %v621_v61 }
 0x453   :  { %v1134_v6 = vpop.f32.mrf.mxu0 }
 0x454   :  { %v834_v7 = vpop.f32.mrf.mxu1 }
 0x455   :  { %v913_v8 = vpop.f32.mrf.mxu0  ;;  %v835_v11 = vadd.f32 %v834_v7, %v691_v63 }
 0x456   :  { %v1139_v9 = vpop.f32.mrf.mxu1  ;;  %v987_v0 = vadd.f32 %v913_v8, %v765_v10 }
 0x457   :  { %v1144_v12 = vpop.f32.mrf.mxu0 }
 0x458   :  { %v983_v13 = vpop.f32.mrf.mxu1 }
 0x459   :  { %v988_v14 = vadd.f32 %v983_v13, %v835_v11 }
 0x45a   :  { %v1149_v15 = vpop.f32.mrf.mxu1 }
 0x45b   :  { %v991_v4 = vadd.f32 %v988_v14, %v987_v0 }
 0x45d   :  { %992 = vadd.xlane.f32.xlu1 %v991_v4 }
 0x4e6   :  { %v993_v16 = vpop.xlane.xlu1 %992 }
 0x4e7   :  { %v994_v17 = vmul.f32 0.00390625, %v993_v16 }
 0x4e9   :  { %v995_v18 = vsub.f32 %v987_v0, %v994_v17  ;;  %v996_v19 = vsub.f32 %v988_v14, %v994_v17 }
 0x4eb   :  { %v997_v20 = vmul.f32 %v995_v18, %v995_v18  ;;  %v998_v21 = vmul.f32 %v996_v19, %v996_v19 }
 0x4ed   :  { %v999_v22 = vadd.f32 %v998_v21, %v997_v20 }
 0x4ef   :  { %1000 = vadd.xlane.f32.xlu0 %v999_v22 }
 0x578   :  { %v1001_v23 = vpop.xlane.xlu0 %1000 }
 0x579   :  { %v1002_v24 = vmul.f32 0.00390625, %v1001_v23 }
 0x57b   :  { %v1003_v25 = vadd.f32 1e-05, %v1002_v24 }
 0x57d   :  { %1164 = vrsqrt.f32 %v1003_v25 }
 0x58a   :  { %v1165_v27 = vpop.eup %1164 }
 0x58b   :  { %v1005_v28 = vmul.f32 %v1165_v27, %v989_v26 }
 0x58d   :  { %1010 = vperm.xlu1 %1161, %v1005_v28   ;;  %v1006_v30 = vmul.f32 %v1005_v28, %v994_v17 }
 0x58f   :  { %v1007_v31 = vsub.f32 %v990_v29, %v1006_v30 }
 0x591   :  { %1017 = vperm.xlu0 %1160, %v1007_v31  }
 0x608   :  { %v1011_v32 = vpop.permute.xlu1 %1010 }
 0x609   :  { %v1013_v33 = vmul.f32 %v1011_v32, %v987_v0  ;;  %v1014_v34 = vmul.f32 %v1011_v32, %v988_v14 }
 0x60c   :  { %v1018_v35 = vpop.permute.xlu0 %1017 }
 0x60d   :  { %v1020_v36 = vadd.f32 %v1018_v35, %v1013_v33  ;;  %v1021_v37 = vadd.f32 %v1018_v35, %v1014_v34 }
 0x60f   :  { %v1022_v38 = vadd.f32 %v1020_v36, %v1300_v1  ;;  %v1023_v39 = vadd.f32 %v1021_v37, %v1306_v2 }
 0x611   :  { %v1024_v40 = vmax.f32 %v1022_v38, 0.0  ;;  %v1025_v41 = vmax.f32 %v1023_v39, 0.0 }
 0x613   :  { %1026 = vst [vmem:[#allocation7] sm:$0xff] %v1024_v40  ;;  %1027 = vst [vmem:[#allocation7 + $0x8] sm:$0xff] %v1025_v41 }
 0x614   :  { %1217 = shalt.err (!%p1214_p0)
}
 0x615   :  { %1039 = dma.vmem_to_hbm [thread:$0]  %s1034_s25, 256, %s1416_s7, [#allocation4], %s1233_s27, %s1233_s27, %s1234_s28  }
 0x616   :  { %1230 = dma.done.wait [#allocation4], 256  }
 0x617   :  { %1231 = vsyncadd [#allocation4], 4294967040 }
 0x618   :  { %1043 = vsyncpa [#allocation3], 1 }
 0x619   :  { %1044 = vsyncpa [#allocation6], 1 }
 0x61a   :  { %1045 = vsyncpa [#allocation4], 1 }

</bundles_post_ra>
